<compile_context>
chip_gen: v6e
topology: v6e:2x2x1
jax: 0.10.0
libtpu: 0.0.40
codegen_flags: <defaults>
</compile_context>

<pallas_src>
import functools

import jax
import jax.numpy as jnp
import numpy as np
from jax.experimental import pallas as pl
from jax.experimental.pallas import tpu as pltpu

# Scaled-down hyperparameters (original: W=500, H=50, C1=C2=32, dim2=16).
SEQ = 8           # H: conv image height / sequence length
EMB = 32          # W: embedding width = conv kernel width and stride
C1 = 16           # conv1 output channels
C2 = 16           # conv2 output channels
DIM2 = 16         # MLP hidden width
NUM_CLASSES = 3   # final Linear output width
OUT_PAD = 128     # lane-dense padded output width (sliced back to NUM_CLASSES)
FEAT = C1 * SEQ + C2 * (SEQ + 1)   # flattened conv feature size
NCOL = C1 + 2 * C2                 # packed conv-matmul columns: [conv1|kh0|kh1]
BB = 8                             # batch rows per grid step (sublane multiple)


# ---------------------------------------------------------------------------
# Fused Pallas kernel: conv1 + conv2 + flatten + fc1 + fc2, one grid step per
# BB-batch block.  7 MXU pushes, no chained tiny-dot accumulator.
# ---------------------------------------------------------------------------
def _fused_forward_kernel(s1_ref, s2_ref, ref_ref, perm_ref, wcs_ref,
                          wfa_ref, wfb_ref, wf2_ref,
                          b1_ref, b2t_ref, bf2_ref, out_ref,
                          *, BBk, H, C1k, C2k):
    # Rows of each stream ref are (batch, height)-ordered 2*W receptive fields.
    # One MXU push per stream evaluates conv1 and both conv2 height taps.
    p = (jnp.dot(s1_ref[...], wcs_ref[0], preferred_element_type=jnp.float32)
         + jnp.dot(s2_ref[...], wcs_ref[1], preferred_element_type=jnp.float32)
         + jnp.dot(ref_ref[...], wcs_ref[2], preferred_element_type=jnp.float32))
    # Reorder rows (b, h) -> (h, b) with one exact 0/1 permutation matmul so
    # every per-height row group below is a contiguous, 8-aligned sublane slice.
    p = jnp.dot(perm_ref[...], p, preferred_element_type=jnp.float32)

    conv1 = jnp.maximum(p[:, :C1k] + b1_ref[...], 0.0)         # ReLU(conv1), (BBk*H, C1)
    y0 = p[:, C1k:C1k + C2k]                                   # conv2 tap kh = 0
    y1 = p[:, C1k + C2k:C1k + 2 * C2k]                         # conv2 tap kh = 1

    # Lane-dense flattens (the (B, FEAT) slab): aligned sublane slices + one
    # lane-axis concatenate each -- no minor-dim reshapes, no per-h matmuls.
    conv1_flat = jnp.concatenate(
        [conv1[h * BBk:(h + 1) * BBk, :] for h in range(H)], axis=1)   # (BBk, H*C1)
    y0_flat = jnp.concatenate(
        [y0[h * BBk:(h + 1) * BBk, :] for h in range(H)], axis=1)      # (BBk, H*C2)
    y1_flat = jnp.concatenate(
        [y1[h * BBk:(h + 1) * BBk, :] for h in range(H)], axis=1)      # (BBk, H*C2)

    # conv2 output row h_out sees the kh=0 tap of data row h_out-1 and the
    # kh=1 tap of data row h_out (padding=(1,0), kernel height 2).
    zpad = jnp.zeros((BBk, C2k), jnp.float32)
    pre2 = (jnp.concatenate([zpad, y0_flat], axis=1)
            + jnp.concatenate([y1_flat, zpad], axis=1)
            + b2t_ref[...])                                    # tiled conv2 bias
    conv2_flat = jnp.maximum(pre2, 0.0)                        # (BBk, (H+1)*C2)

    # fc1 as two dense contractions; fc2 as a lane-dense 128-wide store.
    # (b_fc1 is folded into the padded fc2 bias host-side.)
    h1 = (jnp.dot(conv1_flat, wfa_ref[...], preferred_element_type=jnp.float32)
          + jnp.dot(conv2_flat, wfb_ref[...], preferred_element_type=jnp.float32))
    out_ref[...] = (jnp.dot(h1, wf2_ref[...], preferred_element_type=jnp.float32)
                    + bf2_ref[...])


# ---------------------------------------------------------------------------
# Wrapper: host-side weight plumbing (free reshapes only on activations) +
# one gridded pallas_call.
# ---------------------------------------------------------------------------
def conv2d_mlp_slim_forward(s1, s2, ref, params, *, batch_block=BB):
    B, H, two, W = s1.shape
    assert H == SEQ and W == EMB and two == 2

    BBk = batch_block
    Bp = ((B + BBk - 1) // BBk) * BBk
    if Bp != B:                         # sublane-pad the batch; sliced off below
        padw = ((0, Bp - B), (0, 0), (0, 0), (0, 0))
        s1 = jnp.pad(s1, padw)
        s2 = jnp.pad(s2, padw)
        ref = jnp.pad(ref, padw)

    # Row-major reshape only (no HBM transpose/concat pass): row b*H + h holds
    # that stream's 2*W receptive field for (batch b, image row h).
    s1r = s1.reshape(Bp * H, 2 * W)
    s2r = s2.reshape(Bp * H, 2 * W)
    refr = ref.reshape(Bp * H, 2 * W)

    # Conv weights split per input stream (2 of the 6 channels each), columns
    # packed as [conv1 | conv2 kh=0 | conv2 kh=1]  -> (3, 2W, NCOL).
    w1 = params["w_conv1"]              # (C1, 6, 1, W)
    w2 = params["w_conv2"]              # (C2, 6, 2, W)

    def _stream(ci):
        a = w1[:, ci:ci + 2, 0, :].reshape(C1, 2 * W).T
        k0 = w2[:, ci:ci + 2, 0, :].reshape(C2, 2 * W).T
        k1 = w2[:, ci:ci + 2, 1, :].reshape(C2, 2 * W).T
        return jnp.concatenate([a, k0, k1], axis=1)            # (2W, NCOL)

    wcs = jnp.stack([_stream(0), _stream(2), _stream(4)], axis=0)

    # (b,h) -> (h,b) row permutation for one BBk-batch block.
    rb = BBk * H
    perm_np = np.zeros((rb, rb), np.float32)
    t = np.arange(rb)
    perm_np[t, (t % BBk) * H + t // BBk] = 1.0
    perm = jnp.asarray(perm_np)

    # fc1 weights re-permuted from PyTorch's channel-major .view() order
    # (index c*H_out + h) into height-major (h*C + c) rows.
    wf1 = params["w_fc1"]                                       # (FEAT, DIM2)
    wfa = wf1[:C1 * H].reshape(C1, H, DIM2).transpose(1, 0, 2).reshape(H * C1, DIM2)
    wfb = wf1[C1 * H:].reshape(C2, H + 1, DIM2).transpose(1, 0, 2).reshape((H + 1) * C2, DIM2)

    # fc2 zero-padded for a lane-dense store; b_fc1 folded into the fc2 bias.
    wf2p = jnp.zeros((DIM2, OUT_PAD), jnp.float32).at[:, :NUM_CLASSES].set(
        params["w_fc2"])
    bf2_eff = params["b_fc1"] @ params["w_fc2"] + params["b_fc2"]
    bf2p = jnp.zeros((1, OUT_PAD), jnp.float32).at[:, :NUM_CLASSES].set(
        bf2_eff[None, :])

    b1 = params["b_conv1"][None, :]                             # (1, C1)
    b2t = jnp.tile(params["b_conv2"], H + 1)[None, :]           # (1, (H+1)*C2)

    def _full(shape):
        return pl.BlockSpec(shape, lambda i, _s=shape: tuple(0 for _ in _s))

    row_spec = pl.BlockSpec((BBk * H, 2 * W), lambda i: (i, 0))
    kernel = functools.partial(_fused_forward_kernel, BBk=BBk, H=H, C1k=C1, C2k=C2)

    out_padded = pl.pallas_call(
        kernel,
        out_shape=jax.ShapeDtypeStruct((Bp, OUT_PAD), jnp.float32),
        grid=(Bp // BBk,),
        in_specs=[row_spec, row_spec, row_spec,
                  _full(perm.shape), _full(wcs.shape), _full(wfa.shape),
                  _full(wfb.shape), _full(wf2p.shape), _full(b1.shape),
                  _full(b2t.shape), _full(bf2p.shape)],
        out_specs=pl.BlockSpec((BBk, OUT_PAD), lambda i: (i, 0)),
        compiler_params=pltpu.CompilerParams(
            dimension_semantics=("parallel",),
            vmem_limit_bytes=32 * 1024 * 1024),
    )(s1r, s2r, refr, perm, wcs, wfa, wfb, wf2p, b1, b2t, bf2p)

    return out_padded[:B, :NUM_CLASSES]


# ---------------------------------------------------------------------------
# Deterministic parameter init & faithful pure-JAX reference (real conv ops).
# ---------------------------------------------------------------------------
def init_params(key):
    ks = jax.random.split(key, 8)

    def u(k, shape, lo=-0.1, hi=0.1):
        return jax.random.uniform(k, shape, jnp.float32, lo, hi)

    return dict(
        w_conv1=u(ks[0], (C1, 6, 1, EMB)), b_conv1=u(ks[1], (C1,)),
        w_conv2=u(ks[2], (C2, 6, 2, EMB)), b_conv2=u(ks[3], (C2,)),
        w_fc1=u(ks[4], (FEAT, DIM2)),      b_fc1=u(ks[5], (DIM2,)),
        w_fc2=u(ks[6], (DIM2, NUM_CLASSES)), b_fc2=u(ks[7], (NUM_CLASSES,)),
    )


def reference_forward(s1, s2, ref, params):
    data_in = jnp.concatenate([jnp.transpose(s1, (0, 2, 1, 3)),
                               jnp.transpose(s2, (0, 2, 1, 3)),
                               jnp.transpose(ref, (0, 2, 1, 3))], axis=1)
    B = data_in.shape[0]
    W = data_in.shape[-1]

    o1 = jax.lax.conv_general_dilated(
        data_in, params["w_conv1"], window_strides=(1, W),
        padding=((0, 0), (0, 0)),
        dimension_numbers=("NCHW", "OIHW", "NCHW"))
    o1 = jnp.maximum(o1 + params["b_conv1"].reshape(1, -1, 1, 1), 0.0)

    o2 = jax.lax.conv_general_dilated(
        data_in, params["w_conv2"], window_strides=(1, W),
        padding=((1, 1), (0, 0)),
        dimension_numbers=("NCHW", "OIHW", "NCHW"))
    o2 = jnp.maximum(o2 + params["b_conv2"].reshape(1, -1, 1, 1), 0.0)

    out_conv = jnp.concatenate([o1.reshape(B, -1), o2.reshape(B, -1)], axis=1)
    h = out_conv @ params["w_fc1"] + params["b_fc1"]
    return h @ params["w_fc2"] + params["b_fc2"]


if __name__ == "__main__":
    key = jax.random.PRNGKey(0)
    pkey, k1, k2, k3 = jax.random.split(key, 4)
    params = init_params(pkey)

    B = 2
    s1 = jax.random.normal(k1, (B, SEQ, 2, EMB), jnp.float32)
    s2 = jax.random.normal(k2, (B, SEQ, 2, EMB), jnp.float32)
    ref = jax.random.normal(k3, (B, SEQ, 2, EMB), jnp.float32)

    out = jax.block_until_ready(conv2d_mlp_slim_forward(s1, s2, ref, params))
    gold = jax.block_until_ready(reference_forward(s1, s2, ref, params))

    assert out.shape == (B, NUM_CLASSES), out.shape
    np.testing.assert_allclose(np.asarray(out), np.asarray(gold),
                               rtol=5e-4, atol=5e-4)
    print("KERNEL_OK")
</pallas_src>

<mosaic_0001>
module attributes {stable_mosaic.version = 11 : i64} {
  func.func @_fused_forward_kernel(%arg0: i32, %arg1: memref<64x64xf32, #tpu.memory_space<vmem>>, %arg2: memref<64x64xf32, #tpu.memory_space<vmem>>, %arg3: memref<64x64xf32, #tpu.memory_space<vmem>>, %arg4: memref<64x64xf32, #tpu.memory_space<vmem>>, %arg5: memref<3x64x48xf32, #tpu.memory_space<vmem>>, %arg6: memref<128x16xf32, #tpu.memory_space<vmem>>, %arg7: memref<144x16xf32, #tpu.memory_space<vmem>>, %arg8: memref<16x128xf32, #tpu.memory_space<vmem>>, %arg9: memref<1x16xf32, #tpu.memory_space<vmem>>, %arg10: memref<1x144xf32, #tpu.memory_space<vmem>>, %arg11: memref<1x128xf32, #tpu.memory_space<vmem>>, %arg12: memref<8x128xf32, #tpu.memory_space<vmem>>) attributes {dimension_semantics = [#tpu.dimension_semantics<parallel>], iteration_bounds = array<i64: 1>, scalar_prefetch = 0 : i64, scratch_operands = 0 : i64, tpu.core_type = #tpu.core_type<tc>, window_params = [{transform_indices = @transform_0, window_bounds = array<i64: 64, 64>}, {transform_indices = @transform_1, window_bounds = array<i64: 64, 64>}, {transform_indices = @transform_2, window_bounds = array<i64: 64, 64>}, {pipeline_mode = #tpu.pipeline_mode<synchronous>, transform_indices = @transform_3, window_bounds = array<i64: 64, 64>}, {pipeline_mode = #tpu.pipeline_mode<synchronous>, transform_indices = @transform_4, window_bounds = array<i64: 3, 64, 48>}, {pipeline_mode = #tpu.pipeline_mode<synchronous>, transform_indices = @transform_5, window_bounds = array<i64: 128, 16>}, {pipeline_mode = #tpu.pipeline_mode<synchronous>, transform_indices = @transform_6, window_bounds = array<i64: 144, 16>}, {pipeline_mode = #tpu.pipeline_mode<synchronous>, transform_indices = @transform_7, window_bounds = array<i64: 16, 128>}, {pipeline_mode = #tpu.pipeline_mode<synchronous>, transform_indices = @transform_8, window_bounds = array<i64: 1, 16>}, {pipeline_mode = #tpu.pipeline_mode<synchronous>, transform_indices = @transform_9, window_bounds = array<i64: 1, 144>}, {pipeline_mode = #tpu.pipeline_mode<synchronous>, transform_indices = @transform_10, window_bounds = array<i64: 1, 128>}, {transform_indices = @transform_11, window_bounds = array<i64: 8, 128>}]} {
    %c0 = arith.constant 0 : index
    %c0_0 = arith.constant 0 : index
    %0 = vector.load %arg1[%c0, %c0_0] : memref<64x64xf32, #tpu.memory_space<vmem>>, vector<64x64xf32>
    %c0_1 = arith.constant 0 : index
    %c0_2 = arith.constant 0 : index
    %c0_3 = arith.constant 0 : index
    %1 = vector.load %arg5[%c0_1, %c0_2, %c0_3] : memref<3x64x48xf32, #tpu.memory_space<vmem>>, vector<1x64x48xf32>
    %2 = vector.shape_cast %1 : vector<1x64x48xf32> to vector<64x48xf32>
    %cst = arith.constant dense<0.000000e+00> : vector<64x48xf32>
    %3 = tpu.matmul %0, %2, %cst {dimension_numbers = #tpu.dot_dimension_numbers<[1], [0], [0], [1], [0, 0, 1, 1], [], []>} : vector<64x64xf32>, vector<64x48xf32>, vector<64x48xf32> -> vector<64x48xf32>
    %c0_4 = arith.constant 0 : index
    %c0_5 = arith.constant 0 : index
    %4 = vector.load %arg2[%c0_4, %c0_5] : memref<64x64xf32, #tpu.memory_space<vmem>>, vector<64x64xf32>
    %c1 = arith.constant 1 : index
    %c0_6 = arith.constant 0 : index
    %c0_7 = arith.constant 0 : index
    %5 = vector.load %arg5[%c1, %c0_6, %c0_7] : memref<3x64x48xf32, #tpu.memory_space<vmem>>, vector<1x64x48xf32>
    %6 = vector.shape_cast %5 : vector<1x64x48xf32> to vector<64x48xf32>
    %cst_8 = arith.constant dense<0.000000e+00> : vector<64x48xf32>
    %7 = tpu.matmul %4, %6, %cst_8 {dimension_numbers = #tpu.dot_dimension_numbers<[1], [0], [0], [1], [0, 0, 1, 1], [], []>} : vector<64x64xf32>, vector<64x48xf32>, vector<64x48xf32> -> vector<64x48xf32>
    %8 = arith.addf %3, %7 : vector<64x48xf32>
    %c0_9 = arith.constant 0 : index
    %c0_10 = arith.constant 0 : index
    %9 = vector.load %arg3[%c0_9, %c0_10] : memref<64x64xf32, #tpu.memory_space<vmem>>, vector<64x64xf32>
    %c2 = arith.constant 2 : index
    %c0_11 = arith.constant 0 : index
    %c0_12 = arith.constant 0 : index
    %10 = vector.load %arg5[%c2, %c0_11, %c0_12] : memref<3x64x48xf32, #tpu.memory_space<vmem>>, vector<1x64x48xf32>
    %11 = vector.shape_cast %10 : vector<1x64x48xf32> to vector<64x48xf32>
    %cst_13 = arith.constant dense<0.000000e+00> : vector<64x48xf32>
    %12 = tpu.matmul %9, %11, %cst_13 {dimension_numbers = #tpu.dot_dimension_numbers<[1], [0], [0], [1], [0, 0, 1, 1], [], []>} : vector<64x64xf32>, vector<64x48xf32>, vector<64x48xf32> -> vector<64x48xf32>
    %13 = arith.addf %8, %12 : vector<64x48xf32>
    %c0_14 = arith.constant 0 : index
    %c0_15 = arith.constant 0 : index
    %14 = vector.load %arg4[%c0_14, %c0_15] : memref<64x64xf32, #tpu.memory_space<vmem>>, vector<64x64xf32>
    %cst_16 = arith.constant dense<0.000000e+00> : vector<64x48xf32>
    %15 = tpu.matmul %14, %13, %cst_16 {dimension_numbers = #tpu.dot_dimension_numbers<[1], [0], [0], [1], [0, 0, 1, 1], [], []>} : vector<64x64xf32>, vector<64x48xf32>, vector<64x48xf32> -> vector<64x48xf32>
    %16 = vector.extract_strided_slice %15 {offsets = [0, 0], sizes = [64, 16], strides = [1, 1]} : vector<64x48xf32> to vector<64x16xf32>
    %c0_17 = arith.constant 0 : index
    %c0_18 = arith.constant 0 : index
    %17 = vector.load %arg9[%c0_17, %c0_18] : memref<1x16xf32, #tpu.memory_space<vmem>>, vector<1x16xf32>
    %18 = vector.broadcast %17 : vector<1x16xf32> to vector<64x16xf32>
    %19 = arith.addf %16, %18 : vector<64x16xf32>
    %cst_19 = arith.constant 0.000000e+00 : f32
    %20 = vector.broadcast %cst_19 : f32 to vector<64x16xf32>
    %21 = arith.maximumf %19, %20 : vector<64x16xf32>
    %22 = vector.extract_strided_slice %15 {offsets = [0, 16], sizes = [64, 16], strides = [1, 1]} : vector<64x48xf32> to vector<64x16xf32>
    %23 = vector.extract_strided_slice %15 {offsets = [0, 32], sizes = [64, 16], strides = [1, 1]} : vector<64x48xf32> to vector<64x16xf32>
    %24 = vector.extract_strided_slice %21 {offsets = [0, 0], sizes = [8, 16], strides = [1, 1]} : vector<64x16xf32> to vector<8x16xf32>
    %25 = vector.extract_strided_slice %21 {offsets = [8, 0], sizes = [8, 16], strides = [1, 1]} : vector<64x16xf32> to vector<8x16xf32>
    %26 = vector.extract_strided_slice %21 {offsets = [16, 0], sizes = [8, 16], strides = [1, 1]} : vector<64x16xf32> to vector<8x16xf32>
    %27 = vector.extract_strided_slice %21 {offsets = [24, 0], sizes = [8, 16], strides = [1, 1]} : vector<64x16xf32> to vector<8x16xf32>
    %28 = vector.extract_strided_slice %21 {offsets = [32, 0], sizes = [8, 16], strides = [1, 1]} : vector<64x16xf32> to vector<8x16xf32>
    %29 = vector.extract_strided_slice %21 {offsets = [40, 0], sizes = [8, 16], strides = [1, 1]} : vector<64x16xf32> to vector<8x16xf32>
    %30 = vector.extract_strided_slice %21 {offsets = [48, 0], sizes = [8, 16], strides = [1, 1]} : vector<64x16xf32> to vector<8x16xf32>
    %31 = vector.extract_strided_slice %21 {offsets = [56, 0], sizes = [8, 16], strides = [1, 1]} : vector<64x16xf32> to vector<8x16xf32>
    %32 = tpu.concatenate %24, %25, %26, %27, %28, %29, %30, %31 in 1 : vector<8x16xf32>, vector<8x16xf32>, vector<8x16xf32>, vector<8x16xf32>, vector<8x16xf32>, vector<8x16xf32>, vector<8x16xf32>, vector<8x16xf32> -> vector<8x128xf32>
    %33 = vector.extract_strided_slice %22 {offsets = [0, 0], sizes = [8, 16], strides = [1, 1]} : vector<64x16xf32> to vector<8x16xf32>
    %34 = vector.extract_strided_slice %22 {offsets = [8, 0], sizes = [8, 16], strides = [1, 1]} : vector<64x16xf32> to vector<8x16xf32>
    %35 = vector.extract_strided_slice %22 {offsets = [16, 0], sizes = [8, 16], strides = [1, 1]} : vector<64x16xf32> to vector<8x16xf32>
    %36 = vector.extract_strided_slice %22 {offsets = [24, 0], sizes = [8, 16], strides = [1, 1]} : vector<64x16xf32> to vector<8x16xf32>
    %37 = vector.extract_strided_slice %22 {offsets = [32, 0], sizes = [8, 16], strides = [1, 1]} : vector<64x16xf32> to vector<8x16xf32>
    %38 = vector.extract_strided_slice %22 {offsets = [40, 0], sizes = [8, 16], strides = [1, 1]} : vector<64x16xf32> to vector<8x16xf32>
    %39 = vector.extract_strided_slice %22 {offsets = [48, 0], sizes = [8, 16], strides = [1, 1]} : vector<64x16xf32> to vector<8x16xf32>
    %40 = vector.extract_strided_slice %22 {offsets = [56, 0], sizes = [8, 16], strides = [1, 1]} : vector<64x16xf32> to vector<8x16xf32>
    %41 = tpu.concatenate %33, %34, %35, %36, %37, %38, %39, %40 in 1 : vector<8x16xf32>, vector<8x16xf32>, vector<8x16xf32>, vector<8x16xf32>, vector<8x16xf32>, vector<8x16xf32>, vector<8x16xf32>, vector<8x16xf32> -> vector<8x128xf32>
    %42 = vector.extract_strided_slice %23 {offsets = [0, 0], sizes = [8, 16], strides = [1, 1]} : vector<64x16xf32> to vector<8x16xf32>
    %43 = vector.extract_strided_slice %23 {offsets = [8, 0], sizes = [8, 16], strides = [1, 1]} : vector<64x16xf32> to vector<8x16xf32>
    %44 = vector.extract_strided_slice %23 {offsets = [16, 0], sizes = [8, 16], strides = [1, 1]} : vector<64x16xf32> to vector<8x16xf32>
    %45 = vector.extract_strided_slice %23 {offsets = [24, 0], sizes = [8, 16], strides = [1, 1]} : vector<64x16xf32> to vector<8x16xf32>
    %46 = vector.extract_strided_slice %23 {offsets = [32, 0], sizes = [8, 16], strides = [1, 1]} : vector<64x16xf32> to vector<8x16xf32>
    %47 = vector.extract_strided_slice %23 {offsets = [40, 0], sizes = [8, 16], strides = [1, 1]} : vector<64x16xf32> to vector<8x16xf32>
    %48 = vector.extract_strided_slice %23 {offsets = [48, 0], sizes = [8, 16], strides = [1, 1]} : vector<64x16xf32> to vector<8x16xf32>
    %49 = vector.extract_strided_slice %23 {offsets = [56, 0], sizes = [8, 16], strides = [1, 1]} : vector<64x16xf32> to vector<8x16xf32>
    %50 = tpu.concatenate %42, %43, %44, %45, %46, %47, %48, %49 in 1 : vector<8x16xf32>, vector<8x16xf32>, vector<8x16xf32>, vector<8x16xf32>, vector<8x16xf32>, vector<8x16xf32>, vector<8x16xf32>, vector<8x16xf32> -> vector<8x128xf32>
    %cst_20 = arith.constant 0.000000e+00 : f32
    %51 = vector.broadcast %cst_20 : f32 to vector<8x16xf32>
    %52 = tpu.concatenate %51, %41 in 1 : vector<8x16xf32>, vector<8x128xf32> -> vector<8x144xf32>
    %53 = tpu.concatenate %50, %51 in 1 : vector<8x128xf32>, vector<8x16xf32> -> vector<8x144xf32>
    %54 = arith.addf %52, %53 : vector<8x144xf32>
    %c0_21 = arith.constant 0 : index
    %c0_22 = arith.constant 0 : index
    %55 = vector.load %arg10[%c0_21, %c0_22] : memref<1x144xf32, #tpu.memory_space<vmem>>, vector<1x144xf32>
    %56 = vector.broadcast %55 : vector<1x144xf32> to vector<8x144xf32>
    %57 = arith.addf %54, %56 : vector<8x144xf32>
    %cst_23 = arith.constant 0.000000e+00 : f32
    %58 = vector.broadcast %cst_23 : f32 to vector<8x144xf32>
    %59 = arith.maximumf %57, %58 : vector<8x144xf32>
    %c0_24 = arith.constant 0 : index
    %c0_25 = arith.constant 0 : index
    %60 = vector.load %arg6[%c0_24, %c0_25] : memref<128x16xf32, #tpu.memory_space<vmem>>, vector<128x16xf32>
    %cst_26 = arith.constant dense<0.000000e+00> : vector<8x16xf32>
    %61 = tpu.matmul %32, %60, %cst_26 {dimension_numbers = #tpu.dot_dimension_numbers<[1], [0], [0], [1], [0, 0, 1, 1], [], []>} : vector<8x128xf32>, vector<128x16xf32>, vector<8x16xf32> -> vector<8x16xf32>
    %c0_27 = arith.constant 0 : index
    %c0_28 = arith.constant 0 : index
    %62 = vector.load %arg7[%c0_27, %c0_28] : memref<144x16xf32, #tpu.memory_space<vmem>>, vector<144x16xf32>
    %cst_29 = arith.constant dense<0.000000e+00> : vector<8x16xf32>
    %63 = tpu.matmul %59, %62, %cst_29 {dimension_numbers = #tpu.dot_dimension_numbers<[1], [0], [0], [1], [0, 0, 1, 1], [], []>} : vector<8x144xf32>, vector<144x16xf32>, vector<8x16xf32> -> vector<8x16xf32>
    %64 = arith.addf %61, %63 : vector<8x16xf32>
    %c0_30 = arith.constant 0 : index
    %c0_31 = arith.constant 0 : index
    %65 = vector.load %arg8[%c0_30, %c0_31] : memref<16x128xf32, #tpu.memory_space<vmem>>, vector<16x128xf32>
    %cst_32 = arith.constant dense<0.000000e+00> : vector<8x128xf32>
    %66 = tpu.matmul %64, %65, %cst_32 {dimension_numbers = #tpu.dot_dimension_numbers<[1], [0], [0], [1], [0, 0, 1, 1], [], []>} : vector<8x16xf32>, vector<16x128xf32>, vector<8x128xf32> -> vector<8x128xf32>
    %c0_33 = arith.constant 0 : index
    %c0_34 = arith.constant 0 : index
    %67 = vector.load %arg11[%c0_33, %c0_34] : memref<1x128xf32, #tpu.memory_space<vmem>>, vector<1x128xf32>
    %68 = vector.broadcast %67 : vector<1x128xf32> to vector<8x128xf32>
    %69 = arith.addf %66, %68 : vector<8x128xf32>
    %c0_35 = arith.constant 0 : index
    %c0_36 = arith.constant 0 : index
    %70 = vector.load %arg12[%c0_35, %c0_36] : memref<8x128xf32, #tpu.memory_space<vmem>>, vector<8x128xf32>
    tpu.vector_store %arg12[%c0_35, %c0_36], %69 {strides = array<i32>} : memref<8x128xf32, #tpu.memory_space<vmem>>, vector<8x128xf32>,
    return
  }
  func.func @transform_0(%arg0: i32) -> (i32, i32) {
    %c0_i32 = arith.constant 0 : i32
    %c0_i32_0 = arith.constant 0 : i32
    return %arg0, %c0_i32 : i32, i32
  }
  func.func @transform_1(%arg0: i32) -> (i32, i32) {
    %c0_i32 = arith.constant 0 : i32
    %c0_i32_0 = arith.constant 0 : i32
    return %arg0, %c0_i32 : i32, i32
  }
  func.func @transform_2(%arg0: i32) -> (i32, i32) {
    %c0_i32 = arith.constant 0 : i32
    %c0_i32_0 = arith.constant 0 : i32
    return %arg0, %c0_i32 : i32, i32
  }
  func.func @transform_3(%arg0: i32) -> (i32, i32) {
    %c0_i32 = arith.constant 0 : i32
    %c0_i32_0 = arith.constant 0 : i32
    %c0_i32_1 = arith.constant 0 : i32
    return %c0_i32, %c0_i32_0 : i32, i32
  }
  func.func @transform_4(%arg0: i32) -> (i32, i32, i32) {
    %c0_i32 = arith.constant 0 : i32
    %c0_i32_0 = arith.constant 0 : i32
    %c0_i32_1 = arith.constant 0 : i32
    %c0_i32_2 = arith.constant 0 : i32
    return %c0_i32, %c0_i32_0, %c0_i32_1 : i32, i32, i32
  }
  func.func @transform_5(%arg0: i32) -> (i32, i32) {
    %c0_i32 = arith.constant 0 : i32
    %c0_i32_0 = arith.constant 0 : i32
    %c0_i32_1 = arith.constant 0 : i32
    return %c0_i32, %c0_i32_0 : i32, i32
  }
  func.func @transform_6(%arg0: i32) -> (i32, i32) {
    %c0_i32 = arith.constant 0 : i32
    %c0_i32_0 = arith.constant 0 : i32
    %c0_i32_1 = arith.constant 0 : i32
    return %c0_i32, %c0_i32_0 : i32, i32
  }
  func.func @transform_7(%arg0: i32) -> (i32, i32) {
    %c0_i32 = arith.constant 0 : i32
    %c0_i32_0 = arith.constant 0 : i32
    %c0_i32_1 = arith.constant 0 : i32
    return %c0_i32, %c0_i32_0 : i32, i32
  }
  func.func @transform_8(%arg0: i32) -> (i32, i32) {
    %c0_i32 = arith.constant 0 : i32
    %c0_i32_0 = arith.constant 0 : i32
    %c0_i32_1 = arith.constant 0 : i32
    return %c0_i32, %c0_i32_0 : i32, i32
  }
  func.func @transform_9(%arg0: i32) -> (i32, i32) {
    %c0_i32 = arith.constant 0 : i32
    %c0_i32_0 = arith.constant 0 : i32
    %c0_i32_1 = arith.constant 0 : i32
    return %c0_i32, %c0_i32_0 : i32, i32
  }
  func.func @transform_10(%arg0: i32) -> (i32, i32) {
    %c0_i32 = arith.constant 0 : i32
    %c0_i32_0 = arith.constant 0 : i32
    %c0_i32_1 = arith.constant 0 : i32
    return %c0_i32, %c0_i32_0 : i32, i32
  }
  func.func @transform_11(%arg0: i32) -> (i32, i32) {
    %c0_i32 = arith.constant 0 : i32
    %c0_i32_0 = arith.constant 0 : i32
    return %arg0, %c0_i32 : i32, i32
  }
}

</mosaic_0001>

<bundles_post_ra>
// kernel: tpu_custom_call.1
= control target key start
LH: loop header
LB: loop body
LE: loop exit
PB: predicated region body
PF: predicated region fallthrough
CT: control target
= control target key end

     0   :  { %vm72_vm0 = vcmask 523264   ;;  %s1864_s0 = inlined_call_operand.vmem [shape: f32[64,64], index: 0, kind: input, shape index: {}]   ;;  %s1865_s1 = inlined_call_operand.vmem [shape: f32[64,64], index: 1, kind: input, shape index: {}]   ;;  %s1866_s2 = inlined_call_operand.vmem [shape: f32[64,64], index: 2, kind: input, shape index: {}]   ;;  %s1867_s3 = inlined_call_operand.vmem [shape: f32[64,64], index: 3, kind: input, shape index: {}]   ;;  %s1868_s4 = inlined_call_operand.vmem [shape: f32[3,64,48], index: 4, kind: input, shape index: {}]   ;;  %s1869_s5 = inlined_call_operand.vmem [shape: f32[128,16], index: 5, kind: input, shape index: {}]   ;;  %s1870_s6 = inlined_call_operand.vmem [shape: f32[144,16], index: 6, kind: input, shape index: {}]   ;;  %s1871_s7 = inlined_call_operand.vmem [shape: f32[16,128], index: 7, kind: input, shape index: {}]   ;;  %s1872_s8 = inlined_call_operand.vmem [shape: f32[1,16], index: 8, kind: input, shape index: {}]   ;;  %s1873_s9 = inlined_call_operand.vmem [shape: f32[1,144], index: 9, kind: input, shape index: {}]   ;;  %s1874_s10 = inlined_call_operand.vmem [shape: f32[1,128], index: 10, kind: input, shape index: {}]   ;;  %s1875_s11 = inlined_call_operand.hbm [shape: f32[8,128], index: 11, kind: output, shape index: {}]  }
   0x1   :  { %v1054_v0 = vld [vmem:[%s1868_s4 + $0x78] sm:$0xff]  ;;  %v1053_v2 = vld [vmem:[%s1868_s4 + $0x70] sm:$0xff]  ;;  %v1052_v4 = vld [vmem:[%s1868_s4 + $0x68] sm:$0xff] }
   0x2   :  { %v54_v1 = vld [vmem:[%s1868_s4 + $0x38] sm:$0xff]  ;;  %1183 = vmatprep.subr.mxu0 %v1054_v0  ;;  %v53_v3 = vld [vmem:[%s1868_s4 + $0x30] sm:$0xff]  ;;  %v52_v5 = vld [vmem:[%s1868_s4 + $0x28] sm:$0xff] }
   0x3   :  { %1211 = vmatprep.subr.mxu1 %v54_v1  ;;  %1184 = vmatpush3.msra.mxu0 %v1054_v0  ;;  %v1051_v6 = vld [vmem:[%s1868_s4 + $0x60] sm:$0xff]  ;;  %v1050_v8 = vld [vmem:[%s1868_s4 + $0x58] sm:$0xff]  ;;  %v1049_v10 = vld [vmem:[%s1868_s4 + $0x50] sm:$0xff] }
   0x4   :  { %1212 = vmatpush3.msra.mxu1 %v54_v1  ;;  %1185 = vmatprep.subr.mxu0 %v1053_v2  ;;  %v51_v7 = vld [vmem:[%s1868_s4 + $0x20] sm:$0xff]  ;;  %v50_v9 = vld [vmem:[%s1868_s4 + $0x18] sm:$0xff]  ;;  %v49_v11 = vld [vmem:[%s1868_s4 + $0x10] sm:$0xff] }
   0x5   :  { %1213 = vmatprep.subr.mxu1 %v53_v3  ;;  %1186 = vmatpush3.msra.mxu0 %v1053_v2  ;;  %v1048_v12 = vld [vmem:[%s1868_s4 + $0x48] sm:$0xff]  ;;  %v1047_v14 = vld [vmem:[%s1868_s4 + $0x40] sm:$0xff]  ;;  %v1078_v20 = vld [vmem:[%s1868_s4 + $0xb8] sm:$0xff] }
   0x6   :  { %1214 = vmatpush3.msra.mxu1 %v53_v3  ;;  %1187 = vmatprep.subr.mxu0 %v1052_v4  ;;  %v48_v13 = vld [vmem:[%s1868_s4 + $0x8] sm:$0xff]  ;;  %v47_v15 = vld [vmem:[%s1868_s4] sm:$0xff]  ;;  %v57_v21 = vld [vmem:[%s1865_s1 + $0x10] sm:$0xff] }
   0x7   :  { %1215 = vmatprep.subr.mxu1 %v52_v5  ;;  %1188 = vmatpush3.msra.mxu0 %v1052_v4  ;;  %v55_v16 = vld [vmem:[%s1865_s1] sm:$0xff]  ;;  %v56_v18 = vld [vmem:[%s1865_s1 + $0x8] sm:$0xff] }
   0x8   :  { %1216 = vmatpush3.msra.mxu1 %v52_v5  ;;  %1189 = vmatprep.subr.mxu0 %v1051_v6  ;;  %v39_v17 = vld [vmem:[%s1864_s0] sm:$0xff]  ;;  %v40_v19 = vld [vmem:[%s1864_s0 + $0x8] sm:$0xff] }
   0x9   :  { %1217 = vmatprep.subr.mxu1 %v51_v7  ;;  %1190 = vmatpush3.msra.mxu0 %v1051_v6 }
   0xa   :  { %1218 = vmatpush3.msra.mxu1 %v51_v7  ;;  %1191 = vmatprep.subr.mxu0 %v1050_v8 }
   0xb   :  { %1219 = vmatprep.subr.mxu1 %v50_v9  ;;  %1192 = vmatpush3.msra.mxu0 %v1050_v8 }
   0xc   :  { %1220 = vmatpush3.msra.mxu1 %v50_v9  ;;  %1193 = vmatprep.subr.mxu0 %v1049_v10 }
   0xd   :  { %1221 = vmatprep.subr.mxu1 %v49_v11  ;;  %1194 = vmatpush3.msra.mxu0 %v1049_v10 }
   0xe   :  { %1222 = vmatpush3.msra.mxu1 %v49_v11  ;;  %1195 = vmatprep.subr.mxu0 %v1048_v12 }
   0xf   :  { %1223 = vmatprep.subr.mxu1 %v48_v13  ;;  %1196 = vmatpush3.msra.mxu0 %v1048_v12 }
  0x10   :  { %1224 = vmatpush3.msra.mxu1 %v48_v13  ;;  %1197 = vmatprep.subr.mxu0 %v1047_v14 }
  0x11   :  { %1225 = vmatprep.subr.mxu1 %v47_v15  ;;  %1198 = vmatpush3.msra.mxu0 %v1047_v14 }
  0x12   :  { %1199 = vmatprep.mubr.msk.f32.mxu0 %vm72_vm0, %v55_v16 }
  0x13   :  { %16 = vsyncpa [#allocation3], 0  ;;  %1226 = vmatpush3.msra.mxu1 %v47_v15  ;;  %1227 = vmatprep.mubr.msk.f32.mxu1 %vm72_vm0, %v39_v17  ;;  %v41_v22 = vld [vmem:[%s1864_s0 + $0x10] sm:$0xff]  ;;  %v42_v24 = vld [vmem:[%s1864_s0 + $0x18] sm:$0xff]  ;;  %s1369_s29 = smov 112   ;;  %s1370_s30 = smov 32  }
  0x14   :  { %1200 = vmatmul.mubr.msk.f32.vlgmr.msra.gmra.mxu0 %vm72_vm0, %v56_v18  ;;  %1228 = vmatmul.mubr.msk.f32.vlgmr.msra.gmra.mxu1 %vm72_vm0, %v40_v19  ;;  %v1077_v23 = vld [vmem:[%s1868_s4 + $0xb0] sm:$0xff]  ;;  %v58_v25 = vld [vmem:[%s1865_s1 + $0x18] sm:$0xff]  ;;  %v1076_v26 = vld [vmem:[%s1868_s4 + $0xa8] sm:$0xff]  ;;  %s1373_s12 = smov 48   ;;  %s1374_s13 = smov 96   ;;  %vm673_vm1 = vcmask 130048  }
  0x15   :  { %1239 = vmatprep.subr.mxu0 %v1078_v20  ;;  %1202 = vmatprep.mubr.msk.f32.mxu0 %vm72_vm0, %v57_v21  ;;  %v59_v27 = vld [vmem:[%s1865_s1 + $0x20] sm:$0xff]  ;;  %v44_v30 = vld [vmem:[%s1864_s0 + $0x28] sm:$0xff]  ;;  %v1074_v32 = vld [vmem:[%s1868_s4 + $0x98] sm:$0xff]  ;;  %s1375_s14 = smov 80   ;;  %vm675_vm2 = vcmask 261120   ;;  %vm677_vm3 = vcmask 392192  }
  0x16   :  { %1240 = vmatpush3.msra.mxu0 %v1078_v20  ;;  %1230 = vmatprep.mubr.msk.f32.mxu1 %vm72_vm0, %v41_v22  ;;  %v1075_v28 = vld [vmem:[%s1868_s4 + $0xa0] sm:$0xff]  ;;  %v60_v31 = vld [vmem:[%s1865_s1 + $0x28] sm:$0xff]  ;;  %v61_v33 = vld [vmem:[%s1865_s1 + $0x30] sm:$0xff]  ;;  %vm680_vm4 = vcmask 654336   ;;  %vm682_vm5 = vcmask 785408   ;;  %vm1377_vm6 = vmmov 0  }
  0x17   :  { %1241 = vmatprep.subr.mxu0 %v1077_v23  ;;  %v43_v29 = vld [vmem:[%s1864_s0 + $0x20] sm:$0xff]  ;;  %v1073_v34 = vld [vmem:[%s1868_s4 + $0x90] sm:$0xff]  ;;  %v46_v36 = vld [vmem:[%s1864_s0 + $0x38] sm:$0xff]  ;;  %vm684_vm7 = vcmask 916480   ;;  %s1378_s19 = smov [#allocation2]  }
  0x18   :  { %1242 = vmatpush3.msra.mxu0 %v1077_v23  ;;  %1231 = vmatmul.mubr.msk.f32.gmra.mxu1 %vm72_vm0, %v42_v24  ;;  %v45_v35 = vld [vmem:[%s1864_s0 + $0x30] sm:$0xff]  ;;  %v62_v37 = vld [vmem:[%s1865_s1 + $0x38] sm:$0xff]  ;;  %v1072_v38 = vld [vmem:[%s1868_s4 + $0x88] sm:$0xff]  ;;  %s1039_s20 = sshll.u32 %s1378_s19, 4  ;;  %s1040_s20 = int_to_ptr.vmem [resolvable:$true] %s1039_s20 }
  0x19   :  { %1203 = vmatmul.mubr.msk.f32.gmra.mxu0 %vm72_vm0, %v58_v25  ;;  %1243 = vmatprep.subr.mxu0 %v1076_v26  ;;  %v331_v39 = vld [vmem:[%s1866_s2] sm:$0xff]  ;;  %v332_v41 = vld [vmem:[%s1866_s2 + $0x8] sm:$0xff]  ;;  %v333_v42 = vld [vmem:[%s1866_s2 + $0x10] sm:$0xff]  ;;  %p1352_p1 = scmp.lt.s32.totalorder %s1040_s20, %s1040_s20 }
  0x1a   :  { %1244 = vmatpush3.msra.mxu0 %v1076_v26  ;;  %1205 = vmatprep.mubr.msk.f32.mxu0 %vm72_vm0, %v59_v27  ;;  %v1071_v40 = vld [vmem:[%s1868_s4 + $0x80] sm:$0xff]  ;;  %v334_v43 = vld [vmem:[%s1866_s2 + $0x18] sm:$0xff]  ;;  %v336_v45 = vld [vmem:[%s1866_s2 + $0x28] sm:$0xff] }
  0x1b   :  { %1245 = vmatprep.subr.mxu0 %v1075_v28  ;;  %1233 = vmatprep.mubr.msk.f32.mxu1 %vm72_vm0, %v43_v29  ;;  %v335_v44 = vld [vmem:[%s1866_s2 + $0x20] sm:$0xff]  ;;  %v337_v46 = vld [vmem:[%s1866_s2 + $0x30] sm:$0xff]  ;;  %v338_v47 = vld [vmem:[%s1866_s2 + $0x38] sm:$0xff] }
  0x1c   :  { %1246 = vmatpush3.msra.mxu0 %v1075_v28  ;;  %1234 = vmatmul.mubr.msk.f32.gmra.mxu1 %vm72_vm0, %v44_v30  ;;  %v485_v48 = vld [vmem:[%s1867_s3] sm:$0xff]  ;;  %v486_v25 = vld [vmem:[%s1867_s3 + $0x8] sm:$0xff]  ;;  %v487_v26 = vld [vmem:[%s1867_s3 + $0x10] sm:$0xff] }
  0x1d   :  { %1206 = vmatmul.mubr.msk.f32.gmra.mxu0 %vm72_vm0, %v60_v31  ;;  %1247 = vmatprep.subr.mxu0 %v1074_v32  ;;  %v488_v27 = vld [vmem:[%s1867_s3 + $0x18] sm:$0xff]  ;;  %v489_v28 = vld [vmem:[%s1867_s3 + $0x20] sm:$0xff]  ;;  %v490_v29 = vld [vmem:[%s1867_s3 + $0x28] sm:$0xff] }
  0x1e   :  { %1248 = vmatpush3.msra.mxu0 %v1074_v32  ;;  %1208 = vmatprep.mubr.msk.f32.mxu0 %vm72_vm0, %v61_v33  ;;  %v491_v30 = vld [vmem:[%s1867_s3 + $0x30] sm:$0xff]  ;;  %v492_v31 = vld [vmem:[%s1867_s3 + $0x38] sm:$0xff]  ;;  %v1095_v33 = vld [vmem:[%s1872_s8] ss:$0 sm:$0xff]  ;;  %s1371_s3 = smov 16   ;;  %s1372_s8 = smov 64  }
  0x1f   :  { %1249 = vmatprep.subr.mxu0 %v1073_v34  ;;  %1236 = vmatprep.mubr.msk.f32.mxu1 %vm72_vm0, %v45_v35 }
  0x20   :  { %1250 = vmatpush3.msra.mxu0 %v1073_v34  ;;  %1237 = vmatmul.mubr.msk.f32.gmra.mxu1 %vm72_vm0, %v46_v36 }
  0x21   :  { %1209 = vmatmul.mubr.msk.f32.gmra.mxu0 %vm72_vm0, %v62_v37  ;;  %1251 = vmatprep.subr.mxu0 %v1072_v38 }
  0x22   :  { %1252 = vmatpush3.msra.mxu0 %v1072_v38  ;;  %1255 = vmatprep.mubr.msk.f32.mxu0 %vm72_vm0, %v331_v39 }
  0x23   :  { %1253 = vmatprep.subr.mxu0 %v1071_v40  ;;  %1283 = vmatprep.mubr.msk.f32.mxu1 %vm72_vm0, %v485_v48 }
  0x24   :  { %1254 = vmatpush3.msra.mxu0 %v1071_v40 }
  0x25   :  { %1256 = vmatmul.mubr.msk.f32.vlgmr.msra.gmra.mxu0 %vm72_vm0, %v332_v41 }
  0x26   :  { %1258 = vmatprep.mubr.msk.f32.mxu0 %vm72_vm0, %v333_v42 }
  0x29   :  { %1259 = vmatmul.mubr.msk.f32.gmra.mxu0 %vm72_vm0, %v334_v43 }
  0x2a   :  { %1261 = vmatprep.mubr.msk.f32.mxu0 %vm72_vm0, %v335_v44 }
  0x2d   :  { %1262 = vmatmul.mubr.msk.f32.gmra.mxu0 %vm72_vm0, %v336_v45 }
  0x2e   :  { %1264 = vmatprep.mubr.msk.f32.mxu0 %vm72_vm0, %v337_v46 }
  0x31   :  { %1265 = vmatmul.mubr.msk.f32.gmra.mxu0 %vm72_vm0, %v338_v47 }
  0xd4   :  { %v1201_v49 = vpop.f32.mrf.mxu0  ;;  %v1229_v50 = vpop.f32.mrf.mxu1 }
  0xd5   :  { %v298_v20 = vadd.f32 %v1229_v50, %v1201_v49  ;;  %v804_v49 = vld [vmem:[%s1870_s6 + $0x78] sm:$0xff]  ;;  %v1376_v50 = vmov 0.0  }
  0xd6   :  { %v163_v51 = vpop.f32.mrf.mxu0  ;;  %v292_v52 = vpop.f32.mrf.mxu1  ;;  %810 = vmatprep.subr.mxu0 %v1376_v50 }
  0xd7   :  { %v293_v22 = vadd.f32 %v292_v52, %v163_v51  ;;  %v788_v51 = vld [vmem:[%s1869_s5 + $0x78] sm:$0xff]  ;;  %v803_v52 = vld [vmem:[%s1870_s6 + $0x70] sm:$0xff]  ;;  %811 = vmatpush1.msra.mxu0 %v804_v49 }
  0xd8   :  { %v1232_v54 = vpop.f32.mrf.mxu1  ;;  %812 = vmatprep.subr.mxu0 %v1376_v50 }
  0xd9   :  { %v1204_v53 = vpop.f32.mrf.mxu0  ;;  %813 = vmatpush1.msra.mxu0 %v803_v52 }
  0xda   :  { %v302_v57 = vpop.f32.mrf.mxu1  ;;  %v308_v16 = vadd.f32 %v1232_v54, %v1204_v53  ;;  %v787_v53 = vld [vmem:[%s1869_s5 + $0x70] sm:$0xff]  ;;  %814 = vmatprep.subr.mxu0 %v1376_v50 }
  0xdb   :  { %v173_v55 = vpop.f32.mrf.mxu0 }
  0xdc   :  { %v1235_v60 = vpop.f32.mrf.mxu1  ;;  %v303_v18 = vadd.f32 %v302_v57, %v173_v55  ;;  %v786_v57 = vld [vmem:[%s1869_s5 + $0x68] sm:$0xff] }
  0xdd   :  { %v1207_v56 = vpop.f32.mrf.mxu0 }
  0xde   :  { %v312_v63 = vpop.f32.mrf.mxu1  ;;  %v318_v12 = vadd.f32 %v1235_v60, %v1207_v56  ;;  %v802_v56 = vld [vmem:[%s1870_s6 + $0x68] sm:$0xff] }
  0xdf   :  { %v183_v58 = vpop.f32.mrf.mxu0  ;;  %815 = vmatpush1.msra.mxu0 %v802_v56 }
  0xe0   :  { %v1238_v2 = vpop.f32.mrf.mxu1  ;;  %v313_v14 = vadd.f32 %v312_v63, %v183_v58  ;;  %v801_v58 = vld [vmem:[%s1870_s6 + $0x60] sm:$0xff]  ;;  %816 = vmatprep.subr.mxu0 %v1376_v50  ;;  %v784_v63 = vld [vmem:[%s1869_s5 + $0x58] sm:$0xff] }
  0xe1   :  { %v1210_v59 = vpop.f32.mrf.mxu0  ;;  %817 = vmatpush1.msra.mxu0 %v801_v58 }
  0xe2   :  { %v322_v5 = vpop.f32.mrf.mxu1  ;;  %v328_v7 = vadd.f32 %v1238_v2, %v1210_v59  ;;  %818 = vmatprep.subr.mxu0 %v1376_v50  ;;  %v798_v2 = vld [vmem:[%s1870_s6 + $0x48] sm:$0xff] }
  0xe3   :  { %v193_v61 = vpop.f32.mrf.mxu0 }
  0xe4   :  { %v323_v9 = vadd.f32 %v322_v5, %v193_v61  ;;  %v785_v61 = vld [vmem:[%s1869_s5 + $0x60] sm:$0xff]  ;;  %v782_v5 = vld [vmem:[%s1869_s5 + $0x48] sm:$0xff] }
  0xe5   :  { %v1257_v62 = vpop.f32.mrf.mxu0 }
  0xe6   :  { %v478_v23 = vadd.f32 %v1257_v62, %v298_v20  ;;  %v800_v62 = vld [vmem:[%s1870_s6 + $0x58] sm:$0xff] }
  0xe7   :  { %v438_v0 = vpop.f32.mrf.mxu0  ;;  %819 = vmatpush1.msra.mxu0 %v800_v62  ;;  %v776_v20 = vld [vmem:[%s1869_s5 + $0x18] sm:$0xff] }
  0xe8   :  { %v477_v24 = vadd.f32 %v438_v0, %v293_v22  ;;  %v799_v0 = vld [vmem:[%s1870_s6 + $0x50] sm:$0xff]  ;;  %820 = vmatprep.subr.mxu0 %v1376_v50 }
  0xe9   :  { %v1260_v1 = vpop.f32.mrf.mxu0  ;;  %821 = vmatpush1.msra.mxu0 %v799_v0 }
  0xea   :  { %v480_v19 = vadd.f32 %v1260_v1, %v308_v16  ;;  %822 = vmatprep.subr.mxu0 %v1376_v50 }
  0xeb   :  { %v448_v3 = vpop.f32.mrf.mxu0  ;;  %823 = vmatpush1.msra.mxu0 %v798_v2 }
  0xec   :  { %v479_v21 = vadd.f32 %v448_v3, %v303_v18  ;;  %v783_v3 = vld [vmem:[%s1869_s5 + $0x50] sm:$0xff]  ;;  %824 = vmatprep.subr.mxu0 %v1376_v50  ;;  %v777_v18 = vld [vmem:[%s1869_s5 + $0x20] sm:$0xff] }
  0xed   :  { %v1263_v4 = vpop.f32.mrf.mxu0 }
  0xee   :  { %v482_v15 = vadd.f32 %v1263_v4, %v318_v12  ;;  %v797_v4 = vld [vmem:[%s1870_s6 + $0x40] sm:$0xff] }
  0xef   :  { %v458_v6 = vpop.f32.mrf.mxu0  ;;  %825 = vmatpush1.msra.mxu0 %v797_v4  ;;  %v793_v12 = vld [vmem:[%s1870_s6 + $0x20] sm:$0xff] }
  0xf0   :  { %v481_v17 = vadd.f32 %v458_v6, %v313_v14  ;;  %v796_v6 = vld [vmem:[%s1870_s6 + $0x38] sm:$0xff]  ;;  %826 = vmatprep.subr.mxu0 %v1376_v50 }
  0xf1   :  { %v1266_v8 = vpop.f32.mrf.mxu0  ;;  %827 = vmatpush1.msra.mxu0 %v796_v6  ;;  %v792_v14 = vld [vmem:[%s1870_s6 + $0x18] sm:$0xff] }
  0xf2   :  { %v484_v10 = vadd.f32 %v1266_v8, %v328_v7  ;;  %v781_v7 = vld [vmem:[%s1869_s5 + $0x40] sm:$0xff]  ;;  %v795_v8 = vld [vmem:[%s1870_s6 + $0x30] sm:$0xff]  ;;  %828 = vmatprep.subr.mxu0 %v1376_v50 }
  0xf3   :  { %v468_v11 = vpop.f32.mrf.mxu0  ;;  %829 = vmatpush1.msra.mxu0 %v795_v8 }
  0xf4   :  { %v483_v13 = vadd.f32 %v468_v11, %v323_v9  ;;  %1267 = vmatprep.subr.mxu1 %v484_v10  ;;  %v780_v9 = vld [vmem:[%s1869_s5 + $0x38] sm:$0xff]  ;;  %v779_v11 = vld [vmem:[%s1869_s5 + $0x30] sm:$0xff]  ;;  %830 = vmatprep.subr.mxu0 %v1376_v50 }
  0xf5   :  { %1268 = vmatpush3.msra.mxu1 %v484_v10  ;;  %v794_v10 = vld [vmem:[%s1870_s6 + $0x28] sm:$0xff] }
  0xf6   :  { %1269 = vmatprep.subr.mxu1 %v483_v13  ;;  %831 = vmatpush1.msra.mxu0 %v794_v10 }
  0xf7   :  { %1270 = vmatpush3.msra.mxu1 %v483_v13  ;;  %v778_v13 = vld [vmem:[%s1869_s5 + $0x28] sm:$0xff]  ;;  %832 = vmatprep.subr.mxu0 %v1376_v50 }
  0xf8   :  { %1271 = vmatprep.subr.mxu1 %v482_v15  ;;  %833 = vmatpush1.msra.mxu0 %v793_v12 }
  0xf9   :  { %1272 = vmatpush3.msra.mxu1 %v482_v15  ;;  %834 = vmatprep.subr.mxu0 %v1376_v50  ;;  %v791_v15 = vld [vmem:[%s1870_s6 + $0x10] sm:$0xff] }
  0xfa   :  { %1273 = vmatprep.subr.mxu1 %v481_v17  ;;  %835 = vmatpush1.msra.mxu0 %v792_v14 }
  0xfb   :  { %1274 = vmatpush3.msra.mxu1 %v481_v17  ;;  %836 = vmatprep.subr.mxu0 %v1376_v50  ;;  %v790_v17 = vld [vmem:[%s1870_s6 + $0x8] sm:$0xff] }
  0xfc   :  { %1275 = vmatprep.subr.mxu1 %v480_v19  ;;  %837 = vmatpush1.msra.mxu0 %v791_v15 }
  0xfd   :  { %1276 = vmatpush3.msra.mxu1 %v480_v19  ;;  %838 = vmatprep.subr.mxu0 %v1376_v50  ;;  %v789_v19 = vld [vmem:[%s1870_s6] sm:$0xff] }
  0xfe   :  { %1277 = vmatprep.subr.mxu1 %v479_v21  ;;  %839 = vmatpush1.msra.mxu0 %v790_v17 }
  0xff   :  { %1278 = vmatpush3.msra.mxu1 %v479_v21  ;;  %840 = vmatprep.subr.mxu0 %v1376_v50 }
 0x100   :  { %1279 = vmatprep.subr.mxu1 %v478_v23  ;;  %841 = vmatpush1.msra.mxu0 %v789_v19 }
 0x101   :  { %1280 = vmatpush3.msra.mxu1 %v478_v23  ;;  %870 = vmatprep.subr.mxu0 %v1376_v50 }
 0x102   :  { %1281 = vmatprep.subr.mxu1 %v477_v24 }
 0x103   :  { %1282 = vmatpush3.msra.mxu1 %v477_v24 }
 0x104   :  { %1284 = vmatmul.mubr.msk.f32.vlgmr.msra.gmra.mxu1 %vm72_vm0, %v486_v25  ;;  %1295 = vmatprep.subr.mxu1 %v1376_v50  ;;  %v806_v25 = vld [vmem:[%s1870_s6 + $0x88] sm:$0xff] }
 0x105   :  { %1286 = vmatprep.mubr.msk.f32.mxu1 %vm72_vm0, %v487_v26  ;;  %1296 = vmatpush3.msra.mxu1 %v788_v51  ;;  %v775_v26 = vld [vmem:[%s1869_s5 + $0x10] sm:$0xff] }
 0x106   :  { %1297 = vmatprep.subr.mxu1 %v1376_v50  ;;  %871 = vmatpush2.msra.mxu0 %v806_v25 }
 0x107   :  { %1298 = vmatpush3.msra.mxu1 %v787_v53  ;;  %872 = vmatprep.subr.mxu0 %v1376_v50 }
 0x108   :  { %1287 = vmatmul.mubr.msk.f32.gmra.mxu1 %vm72_vm0, %v488_v27  ;;  %1299 = vmatprep.subr.mxu1 %v1376_v50  ;;  %v805_v27 = vld [vmem:[%s1870_s6 + $0x80] sm:$0xff] }
 0x109   :  { %1289 = vmatprep.mubr.msk.f32.mxu1 %vm72_vm0, %v489_v28  ;;  %1300 = vmatpush3.msra.mxu1 %v786_v57  ;;  %v774_v28 = vld [vmem:[%s1869_s5 + $0x8] sm:$0xff] }
 0x10a   :  { %1301 = vmatprep.subr.mxu1 %v1376_v50  ;;  %873 = vmatpush2.msra.mxu0 %v805_v27 }
 0x10b   :  { %1302 = vmatpush3.msra.mxu1 %v785_v61 }
 0x10c   :  { %1290 = vmatmul.mubr.msk.f32.gmra.mxu1 %vm72_vm0, %v490_v29  ;;  %1303 = vmatprep.subr.mxu1 %v1376_v50 }
 0x10d   :  { %1292 = vmatprep.mubr.msk.f32.mxu1 %vm72_vm0, %v491_v30  ;;  %1304 = vmatpush3.msra.mxu1 %v784_v63 }
 0x10e   :  { %1305 = vmatprep.subr.mxu1 %v1376_v50 }
 0x10f   :  { %1306 = vmatpush3.msra.mxu1 %v783_v3 }
 0x110   :  { %1293 = vmatmul.mubr.msk.f32.gmra.mxu1 %vm72_vm0, %v492_v31  ;;  %1307 = vmatprep.subr.mxu1 %v1376_v50 }
 0x111   :  { %1308 = vmatpush3.msra.mxu1 %v782_v5  ;;  %1327 = vmatprep.mubr.msk.f32.mxu1 %vm1377_vm6, %v1376_v50 }
 0x112   :  { %1309 = vmatprep.subr.mxu1 %v1376_v50 }
 0x113   :  { %1310 = vmatpush3.msra.mxu1 %v781_v7 }
 0x114   :  { %1311 = vmatprep.subr.mxu1 %v1376_v50 }
 0x115   :  { %1312 = vmatpush3.msra.mxu1 %v780_v9 }
 0x116   :  { %1313 = vmatprep.subr.mxu1 %v1376_v50 }
 0x117   :  { %1314 = vmatpush3.msra.mxu1 %v779_v11 }
 0x118   :  { %1315 = vmatprep.subr.mxu1 %v1376_v50 }
 0x119   :  { %1316 = vmatpush3.msra.mxu1 %v778_v13 }
 0x11a   :  { %1317 = vmatprep.subr.mxu1 %v1376_v50 }
 0x11b   :  { %1318 = vmatpush3.msra.mxu1 %v777_v18 }
 0x11c   :  { %1319 = vmatprep.subr.mxu1 %v1376_v50 }
 0x11d   :  { %1320 = vmatpush3.msra.mxu1 %v776_v20 }
 0x11e   :  { %1321 = vmatprep.subr.mxu1 %v1376_v50 }
 0x11f   :  { %1322 = vmatpush3.msra.mxu1 %v775_v26 }
 0x120   :  { %1323 = vmatprep.subr.mxu1 %v1376_v50 }
 0x121   :  { %1324 = vmatpush3.msra.mxu1 %v774_v28  ;;  %v1097_v28 = vld [vmem:[%s1874_s10] ss:$0 sm:$0xff] }
 0x122   :  { %1325 = vmatprep.subr.mxu1 %v1376_v50 }
 0x1c4   :  { %v1639_v32 = vpop.f32.mrf.mxu1 }
 0x1c5   :  { %v630_v44 = vadd.f32 %v1639_v32, %v1095_v33 }
 0x1c6   :  { %v583_v34 = vpop.f32.mrf.mxu1 }
 0x1c7   :  { %v1644_v35 = vadd.f32 %v1095_v33, %v583_v34  ;;  %687 = vrot.lane.b32.xlu0 %v583_v34, %s1369_s29  ;;  %v638_v48 = vmax.f32 %v630_v44, 0.0 }
 0x1c8   :  { %v1288_v36 = vpop.f32.mrf.mxu1 }
 0x1c9   :  { %695 = vrot.lane.b32.xlu1 %v1288_v36, %s1370_s30  ;;  %v632_v46 = vadd.f32 %v1288_v36, %v1095_v33 }
 0x1ca   :  { %v1648_v37 = vpop.f32.mrf.mxu1 }
 0x1cb   :  { %691 = vrot.lane.b32.xlu0 %v1648_v37, %s1371_s3  ;;  %v631_v45 = vadd.f32 %v1095_v33, %v1648_v37  ;;  %v640_v55 = vmax.f32 %v632_v46, 0.0 }
 0x1cc   :  { %v1291_v38 = vpop.f32.mrf.mxu1 }
 0x1cd   :  { %v1652_v39 = vadd.f32 %v1291_v38, %v1095_v33  ;;  %v639_v47 = vmax.f32 %v631_v45, 0.0 }
 0x1ce   :  { %v603_v40 = vpop.f32.mrf.mxu1 }
 0x1cf   :  { %703 = vrot.lane.b32.xlu0 %v1291_v38, %s1372_s8  ;;  %699 = vrot.lane.b32.xlu1 %v603_v40, %s1373_s12  ;;  %v633_v54 = vadd.f32 %v1095_v33, %v603_v40  ;;  %v642_v46 = vmax.f32 %v1652_v39, 0.0 }
 0x1d0   :  { %v1294_v41 = vpop.f32.mrf.mxu1 }
 0x1d1   :  { %v1656_v42 = vadd.f32 %v1294_v41, %v1095_v33  ;;  %v641_v60 = vmax.f32 %v633_v54, 0.0 }
 0x1d2   :  { %v613_v43 = vpop.f32.mrf.mxu1 }
 0x1d3   :  { %711 = vrot.lane.b32.xlu0 %v1294_v41, %s1374_s13  ;;  %707 = vrot.lane.b32.xlu1 %v613_v43, %s1375_s14  ;;  %v635_v59 = vadd.f32 %v1095_v33, %v613_v43  ;;  %v773_v33 = vld [vmem:[%s1869_s5] sm:$0xff]  ;;  %v644_v52 = vmax.f32 %v1656_v42, 0.0 }
 0x1d4   :  { %1326 = vmatpush3.msra.mxu1 %v773_v33  ;;  %v757_v42 = vld [vmem:[%s1873_s9] sm:$0x3] }
 0x1d5   :  { %v643_v1 = vmax.f32 %v635_v59, 0.0  ;;  %1330 = vmatprep.subr.mxu1 %v1376_v50 }
 0x1d7   :  { %725 = vrot.lane.b32.xlu0 %v1639_v32, %s1369_s29  ;;  %721 = vrot.lane.b32.xlu1 %v583_v34, %s1374_s13 }
 0x1db   :  { %731 = vrot.lane.b32.xlu0 %v603_v40, %s1370_s30  ;;  %728 = vrot.lane.b32.xlu1 %v1288_v36, %s1371_s3 }
 0x1df   :  { %740 = vrot.lane.b32.xlu0 %v1294_v41, %s1375_s14  ;;  %734 = vrot.lane.b32.xlu1 %v1291_v38, %s1373_s12 }
 0x1e3   :  { %650 = vrot.lane.b32.xlu0 %v639_v47, %s1370_s30  ;;  %646 = vrot.lane.b32.xlu1 %v638_v48, %s1371_s3 }
 0x1e7   :  { %737 = vrot.lane.b32.xlu0 %v613_v43, %s1372_s8  ;;  %654 = vrot.lane.b32.xlu1 %v640_v55, %s1373_s12  ;;  %v637_v55 = vmax.f32 %v1644_v35, 0.0 }
 0x1eb   :  { %658 = vrot.lane.b32.xlu0 %v641_v60, %s1372_s8  ;;  %v759_v60 = vlaneseq }
 0x1ed   :  { %v760_v61 = vshrl.u32 %v759_v60, 7 }
 0x1ef   :  { %666 = vrot.lane.b32.xlu0 %v643_v1, %s1374_s13  ;;  %v765_v62 = vsub.s32 1, %v760_v61  ;;  %v761_v35 = vsub.s32 0, %v760_v61 }
 0x1f1   :  { %v766_v2 = vrot.slane %v757_v42, %v765_v62  ;;  %v762_v4 = vrot.slane %v757_v42, %v761_v35 }
 0x239   :  { %v688_v16 = vpop.permute.xlu0 %687 }
 0x23a   :  { %v714_v21 = vsel %vm673_vm1, %v688_v16, %v1639_v32 }
 0x23b   :  { %v696_v22 = vpop.permute.xlu1 %695 }
 0x23d   :  { %v692_v23 = vpop.permute.xlu0 %691 }
 0x23e   :  { %v715_v24 = vsel %vm675_vm2, %v714_v21, %v692_v23  ;;  %v951_v21 = vld [vmem:[%s1871_s7 + $0x8] sm:$0xff] }
 0x23f   :  { %v716_v30 = vsel %vm677_vm3, %v715_v24, %v696_v22  ;;  %v950_v22 = vld [vmem:[%s1871_s7] sm:$0xff]  ;;  %s1347_s7 = scalar_lea.vmem %s1040_s20, 128 }
 0x240   :  { %p1348_p0 = scmp.ne.s32.totalorder %s1040_s20, %s1347_s7  ;;  %p1353_p2 = scmp.lt.s32.totalorder %s1347_s7, %s1347_s7 }
 0x241   :  { %v704_v29 = vpop.permute.xlu0 %703  ;;  %v700_v31 = vpop.permute.xlu1 %699 }
 0x242   :  { %v717_v32 = vsel %vm72_vm0, %v716_v30, %v700_v31  ;;  %p1354_p3 = por %p1353_p2, %p1352_p1 }
 0x243   :  { %v718_v36 = vsel %vm680_vm4, %v717_v32, %v704_v29 }
 0x244   :  { %p1355_p4 = pnand %p1354_p3, %p1348_p0 }
 0x245   :  { %v712_v34 = vpop.permute.xlu0 %711  ;;  %v708_v38 = vpop.permute.xlu1 %707 }
 0x246   :  { %v719_v40 = vsel %vm682_vm5, %v718_v36, %v708_v38 }
 0x247   :  { %v720_v41 = vsel %vm684_vm7, %v719_v40, %v712_v34 }
 0x248   :  { %751 = vrot.lane.b32.xlu1 %v720_v41, %s1371_s3 }
 0x249   :  { %v726_v43 = vpop.permute.xlu0 %725  ;;  %v722_v44 = vpop.permute.xlu1 %721 }
 0x24a   :  { %v743_v45 = vsel %vm673_vm1, %v722_v44, %v726_v43 }
 0x24b   :  { %v744_v48 = vsel %vm675_vm2, %v743_v45, %v1648_v37 }
 0x24c   :  { %662 = vrot.lane.b32.xlu1 %v642_v46, %s1375_s14 }
 0x24d   :  { %v732_v47 = vpop.permute.xlu0 %731  ;;  %v729_v49 = vpop.permute.xlu1 %728 }
 0x24e   :  { %v745_v51 = vsel %vm677_vm3, %v744_v48, %v729_v49 }
 0x24f   :  { %v746_v0 = vsel %vm72_vm0, %v745_v51, %v732_v47 }
 0x250   :  { %670 = vrot.lane.b32.xlu1 %v644_v52, %s1369_s29 }
 0x251   :  { %v741_v53 = vpop.permute.xlu0 %740  ;;  %v735_v54 = vpop.permute.xlu1 %734 }
 0x252   :  { %v747_v1 = vsel %vm680_vm4, %v746_v0, %v735_v54 }
 0x255   :  { %v651_v56 = vpop.permute.xlu0 %650  ;;  %v647_v57 = vpop.permute.xlu1 %646 }
 0x256   :  { %v674_v39 = vsel %vm673_vm1, %v637_v55, %v647_v57 }
 0x257   :  { %v676_v58 = vsel %vm675_vm2, %v674_v39, %v651_v56 }
 0x259   :  { %v655_v59 = vpop.permute.xlu1 %654  ;;  %v738_v63 = vpop.permute.xlu0 %737 }
 0x25a   :  { %v678_v37 = vsel %vm677_vm3, %v676_v58, %v655_v59  ;;  %v748_v3 = vsel %vm682_vm5, %v747_v1, %v738_v63 }
 0x25b   :  { %v749_v7 = vsel %vm684_vm7, %v748_v3, %v741_v53 }
 0x25d   :  { %v659_v6 = vpop.permute.xlu0 %658 }
 0x25e   :  { %v679_v12 = vsel %vm72_vm0, %v678_v37, %v659_v6 }
 0x261   :  { %v667_v17 = vpop.permute.xlu0 %666 }
 0x2ba   :  { %v752_v5 = vpop.permute.xlu1 %751 }
 0x2bb   :  { %v754_v8 = vsel %vm673_vm1, 0.0, %v752_v5  ;;  %v770_v9 = vadd.f32 %v766_v2, %v752_v5 }
 0x2bc   :  { %v755_v10 = vadd.f32 %v754_v8, %v749_v7 }
 0x2bd   :  { %v772_v11 = vmax.f32 %v770_v9, 0.0 }
 0x2be   :  { %v769_v13 = vadd.f32 %v762_v4, %v755_v10  ;;  %v663_v14 = vpop.permute.xlu1 %662 }
 0x2bf   :  { %v681_v15 = vsel %vm680_vm4, %v679_v12, %v663_v14  ;;  %1096 = vmatprep.mubr.msk.f32.mxu0 %vm673_vm1, %v772_v11 }
 0x2c0   :  { %v771_v16 = vmax.f32 %v769_v13, 0.0  ;;  %v683_v19 = vsel %vm682_vm5, %v681_v15, %v667_v17 }
 0x2c2   :  { %875 = vmatmul.mubr.f32.vlgmr.msra.gmra.mxu0 %v771_v16  ;;  %v671_v18 = vpop.permute.xlu1 %670 }
 0x2c3   :  { %v685_v20 = vsel %vm684_vm7, %v683_v19, %v671_v18 }
 0x2c4   :  { %1328 = vmatmul.mubr.f32.vlgmr.msra.gmra.mxu1 %v685_v20 }
 0x2c5   :  { %1334 = vmatprep.mubr.msk.f32.mxu1 %vm1377_vm6, %v1376_v50  ;;  %1331 = vmatpush3.msra.mxu1 %v951_v21 }
 0x2c6   :  { %1332 = vmatprep.subr.mxu1 %v1376_v50 }
 0x2c7   :  { %1333 = vmatpush3.msra.mxu1 %v950_v22 }
 0x382   :  { %v876_v23 = vpop.f32.mrf.mxu0 }
 0x384   :  { %v878_v24 = vpop.f32.mrf.mxu0  ;;  %v946_v25 = vpop.f32.mrf.mxu1 }
 0x385   :  { %v947_v26 = vadd.f32 %v946_v25, %v876_v23 }
 0x386   :  { %v1329_v27 = vpop.f32.mrf.mxu1 }
 0x387   :  { %1335 = vmatmul.mubr.msk.f32.vlgmr.msra.gmra.mxu1 %vm673_vm1, %v947_v26 }
 0x447   :  { %v1028_v29 = vpop.f32.mrf.mxu1 }
 0x448   :  { %v1029_v50 = vadd.f32 %v1097_v28, %v1028_v29 }
 0x449   :  { %v1336_v30 = vpop.f32.mrf.mxu1 }
 0x44a   :  { %1032 = vst [vmem:[#allocation2] sm:$0xff] %v1029_v50 }
 0x44b   :  { %1358 = shalt.err (!%p1355_p4)
}
 0x44c   :  { %1042 = dma.vmem_to_hbm [thread:$0]  %s1040_s20, 128, %s1875_s11, [#allocation3]  }
 0x44d   :  { %1367 = dma.done.wait [#allocation3], 128  }
 0x44e   :  { %1368 = vsyncadd [#allocation3], 4294967168 }
 0x44f   :  { %1046 = vsyncpa [#allocation3], 1 }

</bundles_post_ra>
